<compile_context>
chip_gen: v5e
topology: v5e:2x2
jax: 0.10.0
libtpu: 0.0.40
codegen_flags: <defaults>
</compile_context>

<pallas_src>
import functools

import jax
import jax.numpy as jnp
from jax import lax
from jax.experimental import pallas as pl
from jax.experimental.pallas import tpu as pltpu


def _round_up(x, m):
    return ((x + m - 1) // m) * m


# Sublane layout of the packed (8, N_pad) auxiliary VMEM operand.
_ROW_THETA = 0   # [ theta | 0-pad ]                      (dynamic)
_ROW_MULT = 1    # [ theta | lam_eq | lam_ineq | 0-pad ]  (dynamic)
_ROW_BIAS = 2    # [ 0 | b | d | 0-pad ]                  (static)
_ROW_INEQ = 3    # 1.0 on inequality columns, else 0      (static)
_ROW_QUAD = 4    # 1.0 on constraint (eq+ineq) cols       (static)
_NUM_ROWS = 8    # padded to the 8-sublane tile


def _aug_lagrangian_kernel(rho_ref, w_ref, aux_ref, out_ref, *, h_pad, n_pad):
    """Fused augmented-Lagrangian forward.

    rho_ref : (1, 1) SMEM       penalty weight
    w_ref   : (h_pad, n_pad)    [ Q | A^T | C^T | 0-pad ]
    aux_ref : (8, n_pad) VMEM   packed rows (see _ROW_* layout)
    out_ref : (1, 1) SMEM       scalar result
    """
    rho = rho_ref[0, 0]

    theta = aux_ref[_ROW_THETA:_ROW_THETA + 1, :h_pad]        # (1, h_pad)
    mult = aux_ref[_ROW_MULT:_ROW_MULT + 1, :n_pad]           # (1, n_pad)
    bias = aux_ref[_ROW_BIAS:_ROW_BIAS + 1, :n_pad]
    ineq_mask = aux_ref[_ROW_INEQ:_ROW_INEQ + 1, :n_pad]
    quad_mask = aux_ref[_ROW_QUAD:_ROW_QUAD + 1, :n_pad]

    # Single MXU pass: y = [ theta@Q | g | h_pre ] (+ zero padding columns).
    # TODO(synk): use precision=HIGHEST if strict f64-parity is ever required.
    y = jnp.dot(theta, w_ref[...], preferred_element_type=jnp.float32)
    y = y + bias                                              # (1, n_pad)

    # relu only on the inequality columns: y <- y + mask * (relu(y) - y).
    y = y + ineq_mask * (jnp.maximum(y, 0.0) - y)

    # Single cross-lane reduction of
    #   sum_obj  (theta@Q) * theta
    # + sum_eq   g * (lam_eq   + rho/2 * g)
    # + sum_ineq h * (lam_ineq + rho/2 * h)
    # Padding columns have y == mult == 0, so they are inert.
    out_ref[0, 0] = jnp.sum(y * (mult + (0.5 * rho) * quad_mask * y))


def make_augmented_lagrangian(q, a_t, b, c_t, d):
    """Pre-fuse the static problem data once; return a jitted per-call forward.

    The fused weight [Q | A^T | C^T] and the static aux rows (bias, ineq mask,
    quad mask) are built a single time here and captured as constants. Only
    rho / theta / lam_eq / lam_ineq change per AL iteration; those are padded
    and packed inside the jitted closure (a couple of fused lane-dense ops)
    before a single pallas_call launch.
    """
    f32 = jnp.float32
    H = q.shape[0]
    m_eq = a_t.shape[1]
    m_ineq = c_t.shape[1]
    n_total = H + m_eq + m_ineq

    h_pad = _round_up(H, 128)          # contraction dim -> lane-dense LHS
    n_pad = _round_up(n_total, 128)    # fused output columns (n_pad >= h_pad)

    # ---- static, built once --------------------------------------------------
    w = jnp.zeros((h_pad, n_pad), f32)
    w = w.at[:H, :H].set(q.astype(f32))
    w = w.at[:H, H:H + m_eq].set(a_t.astype(f32))
    w = w.at[:H, H + m_eq:n_total].set(c_t.astype(f32))

    bias_row = jnp.concatenate(
        [jnp.zeros((1, H), f32),
         b.astype(f32).reshape(1, m_eq),
         d.astype(f32).reshape(1, m_ineq)], axis=1)
    bias_row = jnp.pad(bias_row, ((0, 0), (0, n_pad - n_total)))

    col = jnp.arange(n_pad)
    ineq_row = ((col >= H + m_eq) & (col < n_total)).astype(f32).reshape(1, n_pad)
    quad_row = ((col >= H) & (col < n_total)).astype(f32).reshape(1, n_pad)

    static_rows = jnp.concatenate([bias_row, ineq_row, quad_row], axis=0)
    pad_rows = jnp.zeros((_NUM_ROWS - 5, n_pad), f32)

    w = jax.block_until_ready(jax.device_put(w))
    static_rows = jax.block_until_ready(jax.device_put(static_rows))

    kernel = functools.partial(_aug_lagrangian_kernel, h_pad=h_pad, n_pad=n_pad)

    cost = pl.CostEstimate(
        flops=2 * h_pad * n_pad + 6 * n_pad,
        transcendentals=0,
        bytes_accessed=4 * (h_pad * n_pad + _NUM_ROWS * n_pad + 2),
    )

    vmem = pl.BlockSpec(memory_space=pltpu.MemorySpace.VMEM)
    smem = pl.BlockSpec(memory_space=pltpu.MemorySpace.SMEM)

    call = pl.pallas_call(
        kernel,
        out_shape=jax.ShapeDtypeStruct((1, 1), jnp.float32),
        in_specs=[smem, vmem, vmem],
        out_specs=smem,
        cost_estimate=cost,
    )

    @jax.jit
    def forward(rho, theta, lam_eq, lam_ineq):
        theta = theta.astype(f32).reshape(1, H)
        theta_row = jnp.pad(theta, ((0, 0), (0, n_pad - H)))
        mult_row = jnp.concatenate(
            [theta,
             lam_eq.astype(f32).reshape(1, m_eq),
             lam_ineq.astype(f32).reshape(1, m_ineq)], axis=1)
        mult_row = jnp.pad(mult_row, ((0, 0), (0, n_pad - n_total)))
        aux = jnp.concatenate([theta_row, mult_row, static_rows, pad_rows], axis=0)
        rho_s = jnp.reshape(rho, (1, 1)).astype(f32)
        return call(rho_s, w, aux)[0, 0]

    return forward


def reference_forward(rho, theta, q, a_t, b, c_t, d, lam_eq, lam_ineq):
    """Plain-JAX re-implementation of the PyTorch forward for validation."""
    f = jnp.sum((theta @ q) * theta)
    g = theta @ a_t + b
    f = f + jnp.sum(lam_eq * g) + rho[0, 0] * 0.5 * jnp.sum(g * g)
    h = jnp.maximum(theta @ c_t + d, 0.0)
    f = f + jnp.sum(lam_ineq * h) + rho[0, 0] * 0.5 * jnp.sum(h * h)
    return f


if __name__ == "__main__":
    H = 32        # inner-model parameter count
    M_EQ = 8      # number of equality constraints
    M_INEQ = 8    # number of inequality constraints

    key = jax.random.PRNGKey(0)
    ks = jax.random.split(key, 9)
    u = lambda k, shape: jax.random.uniform(k, shape, jnp.float32, minval=-1.0, maxval=1.0)

    theta = u(ks[0], (1, H))            # inner-model parameters
    q = u(ks[1], (H, H))                # quadratic objective matrix
    a_t = u(ks[2], (H, M_EQ))           # equality constraint matrix (transposed)
    b = u(ks[3], (1, M_EQ))
    c_t = u(ks[4], (H, M_INEQ))         # inequality constraint matrix (transposed)
    d = u(ks[5], (1, M_INEQ))
    lam_eq = u(ks[6], (1, M_EQ))        # theta_lambda_equality
    lam_ineq = u(ks[7], (1, M_INEQ))    # theta_lambda_inequality
    rho = jnp.ones((1, 1), jnp.float32)  # penalty_weight = 1

    # Static problem data fused/padded once; per-iteration path is jitted.
    forward = make_augmented_lagrangian(q, a_t, b, c_t, d)

    out = jax.block_until_ready(forward(rho, theta, lam_eq, lam_ineq))
    ref = reference_forward(rho, theta, q, a_t, b, c_t, d, lam_eq, lam_ineq)
    assert jnp.allclose(out, ref, rtol=1e-4, atol=1e-4), (out, ref)

    # Second AL "iteration" with new theta/lambdas reuses the cached executable
    # and the pre-fused weight (no re-padding of Q / A / C).
    theta2 = u(ks[8], (1, H))
    out2 = jax.block_until_ready(forward(rho, theta2, lam_eq, lam_ineq))
    ref2 = reference_forward(rho, theta2, q, a_t, b, c_t, d, lam_eq, lam_ineq)
    assert jnp.allclose(out2, ref2, rtol=1e-4, atol=1e-4), (out2, ref2)

    print("KERNEL_OK")
</pallas_src>

<mosaic_0001>
module attributes {stable_mosaic.version = 11 : i64} {
  func.func @_aug_lagrangian_kernel(%arg0: memref<1x1xf32, #tpu.memory_space<smem>>, %arg1: memref<128x128xf32, #tpu.memory_space<vmem>>, %arg2: memref<8x128xf32, #tpu.memory_space<vmem>>, %arg3: memref<1x1xf32, #tpu.memory_space<smem>>) attributes {dimension_semantics = [], scalar_prefetch = 0 : i64, scratch_operands = 0 : i64, tpu.core_type = #tpu.core_type<tc>} {
    %c0 = arith.constant 0 : index
    %c0_0 = arith.constant 0 : index
    %0 = memref.load %arg0[%c0, %c0_0] : memref<1x1xf32, #tpu.memory_space<smem>>
    %c0_1 = arith.constant 0 : index
    %c0_2 = arith.constant 0 : index
    %1 = vector.load %arg2[%c0_1, %c0_2] : memref<8x128xf32, #tpu.memory_space<vmem>>, vector<1x128xf32>
    %c1 = arith.constant 1 : index
    %c0_3 = arith.constant 0 : index
    %2 = vector.load %arg2[%c1, %c0_3] : memref<8x128xf32, #tpu.memory_space<vmem>>, vector<1x128xf32>
    %c2 = arith.constant 2 : index
    %c0_4 = arith.constant 0 : index
    %3 = vector.load %arg2[%c2, %c0_4] : memref<8x128xf32, #tpu.memory_space<vmem>>, vector<1x128xf32>
    %c3 = arith.constant 3 : index
    %c0_5 = arith.constant 0 : index
    %4 = vector.load %arg2[%c3, %c0_5] : memref<8x128xf32, #tpu.memory_space<vmem>>, vector<1x128xf32>
    %c4 = arith.constant 4 : index
    %c0_6 = arith.constant 0 : index
    %5 = vector.load %arg2[%c4, %c0_6] : memref<8x128xf32, #tpu.memory_space<vmem>>, vector<1x128xf32>
    %c0_7 = arith.constant 0 : index
    %c0_8 = arith.constant 0 : index
    %6 = vector.load %arg1[%c0_7, %c0_8] : memref<128x128xf32, #tpu.memory_space<vmem>>, vector<128x128xf32>
    %cst = arith.constant dense<0.000000e+00> : vector<1x128xf32>
    %7 = tpu.matmul %1, %6, %cst {dimension_numbers = #tpu.dot_dimension_numbers<[1], [0], [0], [1], [0, 0, 1, 1], [], []>} : vector<1x128xf32>, vector<128x128xf32>, vector<1x128xf32> -> vector<1x128xf32>
    %8 = arith.addf %7, %3 : vector<1x128xf32>
    %cst_9 = arith.constant 0.000000e+00 : f32
    %9 = vector.broadcast %cst_9 : f32 to vector<1x128xf32>
    %10 = arith.maximumf %8, %9 : vector<1x128xf32>
    %11 = arith.subf %10, %8 : vector<1x128xf32>
    %12 = arith.mulf %4, %11 : vector<1x128xf32>
    %13 = arith.addf %8, %12 : vector<1x128xf32>
    %cst_10 = arith.constant 5.000000e-01 : f32
    %14 = arith.mulf %cst_10, %0 : f32
    %15 = vector.broadcast %14 : f32 to vector<1x128xf32>
    %16 = arith.mulf %15, %5 : vector<1x128xf32>
    %17 = arith.mulf %16, %13 : vector<1x128xf32>
    %18 = arith.addf %2, %17 : vector<1x128xf32>
    %19 = arith.mulf %13, %18 : vector<1x128xf32>
    %20 = vector.shape_cast %19 : vector<1x128xf32> to vector<1x1x128xf32>
    %cst_11 = arith.constant dense<0.000000e+00> : vector<1xf32>
    %21 = vector.multi_reduction <add>, %20, %cst_11 [1, 2] : vector<1x1x128xf32> to vector<1xf32>
    %22 = vector.shape_cast %21 : vector<1xf32> to vector<1x1x1xf32>
    %23 = vector.extract %22[0, 0, 0] : f32 from vector<1x1x1xf32>
    %c0_12 = arith.constant 0 : index
    %c0_13 = arith.constant 0 : index
    %24 = memref.load %arg3[%c0_12, %c0_13] : memref<1x1xf32, #tpu.memory_space<smem>>
    memref.store %23, %arg3[%c0_12, %c0_13] : memref<1x1xf32, #tpu.memory_space<smem>>
    return
  }
}

</mosaic_0001>

<bundles_post_ra>
// kernel: forward.1
= control target key start
LH: loop header
LB: loop body
LE: loop exit
PB: predicated region body
PF: predicated region fallthrough
CT: control target
= control target key end

     0   :  { %9 = vsyncpa [#allocation4], 0  ;;  %s207_s0 = inlined_call_operand.<no memory space> [shape: f32[1,1], index: 0, kind: input, shape index: {}]   ;;  %s208_s1 = inlined_call_operand.hbm [shape: f32[128,128], index: 1, kind: input, shape index: {}]   ;;  %s209_s2 = inlined_call_operand.vmem [shape: f32[8,128], index: 2, kind: input, shape index: {}]   ;;  %s210_s3 = inlined_call_operand.hbm [shape: f32[1,1], index: 3, kind: output, shape index: {}]  }
   0x1   :  { %10 = vsyncpa [#allocation5], 0  ;;  %s17_s14 = sshll.u32 %s208_s1, 4  ;;  %s159_s15 = smov [#allocation3]   ;;  %s18_s14 = int_to_ptr.hbm [resolvable:$true] %s17_s14 }
   0x2   :  { %s19_s16 = sshll.u32 %s159_s15, 4  ;;  %s160_s17 = smov 128   ;;  %s20_s16 = int_to_ptr.vmem [resolvable:$true] %s19_s16 }
   0x3   :  { %s161_s18 = smov 8  }
   0x4   :  { %25 = dma.hbm_to_vmem [thread:$0]  %s18_s14, 2048, %s20_s16, [#allocation4], %s160_s17, %s160_s17, %s161_s18  }
   0x5   :  { %155 = dma.done.wait [#allocation4], 2048  }
   0x6   :  { %156 = vsyncadd [#allocation4], 4294965248  ;;  %v53_v0 = vld [vmem:[#allocation3 + $0x78] sm:$0xff]  ;;  %v52_v1 = vld [vmem:[#allocation3 + $0x70] sm:$0xff]  ;;  %s78_s24 = smul.f32 0.5, %s207_s0  ;;  %vm84_vm0 = vcmask 1040384  }
   0x7   :  { %54 = vmatpush.msra.mxu0 %v53_v0  ;;  %v51_v2 = vld [vmem:[#allocation3 + $0x68] sm:$0xff]  ;;  %v50_v3 = vld [vmem:[#allocation3 + $0x60] sm:$0xff]  ;;  %v49_v4 = vld [vmem:[#allocation3 + $0x58] sm:$0xff]  ;;  %s102_s5 = sshll.u32 %s210_s3, 4  ;;  %s162_s6 = smov [#allocation6]   ;;  %s103_s5 = int_to_ptr.hbm [resolvable:$true] %s102_s5 }
   0x8   :  { %v48_v5 = vld [vmem:[#allocation3 + $0x50] sm:$0xff]  ;;  %v47_v6 = vld [vmem:[#allocation3 + $0x48] sm:$0xff]  ;;  %v46_v7 = vld [vmem:[#allocation3 + $0x40] sm:$0xff]  ;;  %v79_v23 = vstv %s78_s24 }
   0x9   :  { %55 = vmatpush.msra.mxu0 %v52_v1  ;;  %v45_v8 = vld [vmem:[#allocation3 + $0x38] sm:$0xff]  ;;  %v44_v9 = vld [vmem:[#allocation3 + $0x30] sm:$0xff]  ;;  %v43_v10 = vld [vmem:[#allocation3 + $0x28] sm:$0xff] }
   0xa   :  { %v42_v11 = vld [vmem:[#allocation3 + $0x20] sm:$0xff]  ;;  %v41_v12 = vld [vmem:[#allocation3 + $0x18] sm:$0xff]  ;;  %v40_v13 = vld [vmem:[#allocation3 + $0x10] sm:$0xff] }
   0xb   :  { %56 = vmatpush.msra.mxu0 %v51_v2  ;;  %v39_v14 = vld [vmem:[#allocation3 + $0x8] sm:$0xff]  ;;  %v38_v15 = vld [vmem:[#allocation3] sm:$0xff] }
   0xc   :  { %v33_v16 = vld [vmem:[%s209_s2] sm:$0x1]  ;;  %v35_v17 = vld [vmem:[%s209_s2 + $0x2] sm:$0x1]  ;;  %v36_v21 = vld [vmem:[%s209_s2 + $0x3] sm:$0x1] }
   0xd   :  { %57 = vmatpush.msra.mxu0 %v50_v3  ;;  %v37_v22 = vld [vmem:[%s209_s2 + $0x4] sm:$0x1]  ;;  %v34_v28 = vld [vmem:[%s209_s2 + $0x1] sm:$0x1] }
   0xe   :  { %v80_v26 = vmul.f32 %v79_v23, %v37_v22 }
   0xf   :  { %58 = vmatpush.msra.mxu0 %v49_v4 }
  0x11   :  { %59 = vmatpush.msra.mxu0 %v48_v5 }
  0x13   :  { %60 = vmatpush.msra.mxu0 %v47_v6 }
  0x15   :  { %61 = vmatpush.msra.mxu0 %v46_v7 }
  0x17   :  { %62 = vmatpush.msra.mxu0 %v45_v8 }
  0x19   :  { %63 = vmatpush.msra.mxu0 %v44_v9 }
  0x1b   :  { %64 = vmatpush.msra.mxu0 %v43_v10 }
  0x1d   :  { %65 = vmatpush.msra.mxu0 %v42_v11 }
  0x1f   :  { %66 = vmatpush.msra.mxu0 %v41_v12 }
  0x21   :  { %67 = vmatpush.msra.mxu0 %v40_v13 }
  0x23   :  { %68 = vmatpush.msra.mxu0 %v39_v14 }
  0x25   :  { %69 = vmatpush.msra.mxu0 %v38_v15 }
  0x26   :  { %70 = vmatmul.f32.vlgmr.msra.gmra.mxu0 %v33_v16 }
  0xa3   :  { %v71_v18 = vpop.f32.mrf.mxu0 }
  0xa4   :  { %v72_v19 = vadd.f32 %v71_v18, %v35_v17 }
  0xa6   :  { %v74_v20 = vmax.f32 %v72_v19, 0.0 }
  0xa8   :  { %v75_v24 = vsub.f32 %v74_v20, %v72_v19 }
  0xaa   :  { %v76_v25 = vmul.f32 %v75_v24, %v36_v21 }
  0xac   :  { %v77_v27 = vadd.f32 %v76_v25, %v72_v19 }
  0xae   :  { %v81_v29 = vmul.f32 %v80_v26, %v77_v27 }
  0xb0   :  { %v82_v30 = vadd.f32 %v81_v29, %v34_v28 }
  0xb2   :  { %v83_v31 = vmul.f32 %v82_v30, %v77_v27 }
  0xb4   :  { %v85_v32 = vsel %vm84_vm0, %v83_v31, 0.0 }
  0xb5   :  { %86 = vadd.xlane.f32.xlu0 %v85_v32 }
 0x128   :  { %v87_v33 = vpop.xlane.xlu0 %86 }
 0x129   :  { %v88_v34 = vrot.slane %v87_v33, 4 }
 0x12b   :  { %v89_v35 = vadd.f32 %v88_v34, %v87_v33 }
 0x12d   :  { %v90_v36 = vrot.slane %v89_v35, 2 }
 0x12f   :  { %v91_v37 = vadd.f32 %v90_v36, %v89_v35 }
 0x131   :  { %v92_v38 = vrot.slane %v91_v37, 1 }
 0x133   :  { %v93_v39 = vadd.f32 %v92_v38, %v91_v37 }
 0x135   :  { %113 = vpush %v93_v39 }
 0x166   :  { %s114_s2 = spop %113 }
 0x167   :  { %96 = sst [smem:[#allocation6]] %s114_s2 }
 0x168   :  { %105 = dma.smem_to_hbm %s162_s6, 16, %s103_s5, [#allocation5]  }
 0x169   :  { %157 = dma.done.wait [#allocation5], 16  }
 0x16a   :  { %158 = vsyncadd [#allocation5], 4294967280 }
 0x16b   :  { %110 = sfence }
 0x16c   :  { %111 = vsyncpa [#allocation4], 1 }
 0x16d   :  { %112 = vsyncpa [#allocation5], 1 }

</bundles_post_ra>
